<compile_context>
chip_gen: v7x
topology: tpu7x:2x2x1
jax: 0.10.0
libtpu: 0.0.40
codegen_flags: <defaults>
</compile_context>

<pallas_src>
import functools

import jax
import jax.numpy as jnp
from jax.experimental import pallas as pl
from jax.experimental.pallas import tpu as pltpu


def _round_up(a, b):
    return (a + b - 1) // b * b


def _pool_kernel(x_ref, o_ref, *, K):
    # x_ref: (K, R_tile, L_tile) tap-major, L on lanes (contiguous loads)
    # o_ref: (R_tile, L_tile)    lane-dense, unmasked store
    m = x_ref[0]
    for k in range(1, K):          # K is small & static -> unrolled VPU maxes
        m = jnp.maximum(m, x_ref[k])
    o_ref[...] = m


def custom_max_pool1d(x, kernel_size):
    """Forward pass of CustomMaxPool1d.

    x: (N, C, L) in PyTorch NCL layout.
    Returns (N, C, ceil(L / kernel_size)).

    Semantics match the PyTorch module exactly: SAME padding computed with
    stride=1 and applied with constant zeros (the zeros participate in the
    max), followed by nn.MaxPool1d(kernel_size) whose default stride is
    kernel_size, padding=0, ceil_mode=False.
    """
    K = int(kernel_size)
    N, C, L = x.shape
    R = N * C

    # SAME padding exactly as in the PyTorch module (stride=1 in the formula).
    out_dim = L                          # (L + 1 - 1) // 1
    p = max(0, (out_dim - 1) + K - L)    # == K - 1 for L >= 1
    pad_left = p // 2
    pad_right = p - pad_left
    L_pad = L + p

    # nn.MaxPool1d(kernel_size=K): stride defaults to K, padding=0, floor mode.
    L_out = (L_pad - K) // K + 1
    L_trunc = L_out * K                  # <= L_pad; tail dropped

    itemsize = jnp.dtype(x.dtype).itemsize
    sub = max(8, 32 // itemsize)         # sublane multiple: 8 f32 / 16 bf16

    # ---- tile sizing: target ~2 MiB input blocks, (8,128)-aligned ---------
    L_tile = min(_round_up(L_out, 128), 2048)
    target_block_bytes = 2 * 1024 * 1024
    r_budget = max(sub, (target_block_bytes // (K * L_tile * itemsize)) // sub * sub)
    R_tile = min(_round_up(R, sub), r_budget, 1024)

    # Prefer >= 2 grid steps so both v7x TensorCores get work (no-op on tiny
    # inputs and measured-neutral on single-TC v5e/v6e).
    if (_round_up(R, R_tile) // R_tile == 1
            and _round_up(L_out, L_tile) // L_tile == 1):
        if L_tile >= 256 and L_tile % 256 == 0:
            L_tile //= 2
        elif R_tile >= 2 * sub and R_tile % (2 * sub) == 0:
            R_tile //= 2

    R_p = _round_up(R, R_tile)
    L_out_p = _round_up(L_out, L_tile)

    # ---- single fused data-prep pass feeding the kernel --------------------
    # pad -> truncate -> split non-overlapping windows -> tap-major transpose
    # -> tile pad.  Under jit XLA fuses this chain into one producer, i.e. one
    # extra HBM read of x and one write of x_t (no separate second pad pass).
    x2 = x.reshape(R, L)
    x2 = jnp.pad(x2, ((0, 0), (pad_left, pad_right)))[:, :L_trunc]
    x_w = x2.reshape(R, L_out, K)
    x_t = jnp.transpose(x_w, (2, 0, 1))                        # (K, R, L_out)
    x_t = jnp.pad(x_t, ((0, 0), (0, R_p - R), (0, L_out_p - L_out)))

    grid = (R_p // R_tile, L_out_p // L_tile)

    out = pl.pallas_call(
        functools.partial(_pool_kernel, K=K),
        out_shape=jax.ShapeDtypeStruct((R_p, L_out_p), x.dtype),
        grid_spec=pltpu.PrefetchScalarGridSpec(
            num_scalar_prefetch=0,
            grid=grid,
            in_specs=[
                pl.BlockSpec((K, R_tile, L_tile), lambda r, l: (0, r, l)),
            ],
            out_specs=pl.BlockSpec((R_tile, L_tile), lambda r, l: (r, l)),
        ),
        compiler_params=pltpu.CompilerParams(
            dimension_semantics=("parallel", "parallel"),
            vmem_limit_bytes=32 * 1024 * 1024,
        ),
    )(x_t)

    return out[:R, :L_out].reshape(N, C, L_out)


def _reference(x, kernel_size):
    """Pure-JAX reference replicating the PyTorch forward (for validation)."""
    K = int(kernel_size)
    N, C, L = x.shape
    p = max(0, (L - 1) * 1 + K - L)
    pad_left = p // 2
    pad_right = p - pad_left
    x_p = jnp.pad(x, ((0, 0), (0, 0), (pad_left, pad_right)))   # zero pad
    return jax.lax.reduce_window(
        x_p, -jnp.inf, jax.lax.max,
        window_dimensions=(1, 1, K),
        window_strides=(1, 1, K),       # torch MaxPool1d default stride = K
        padding="VALID",                # ceil_mode=False
    )


if __name__ == "__main__":
    # Small shapes consistent with the module's forward:
    #   batch=2, channels=4, spatial length L=16, kernel_size=3
    #   -> SAME pad (1, 1) with zeros, pool stride 3, L_out = ceil(16/3) = 6.
    N, C, L, KSIZE = 2, 4, 16, 3

    key = jax.random.PRNGKey(0)
    x = jax.random.normal(key, (N, C, L), dtype=jnp.float32)

    fwd = jax.jit(functools.partial(custom_max_pool1d, kernel_size=KSIZE))
    out = fwd(x)
    out = jax.block_until_ready(out)

    ref = _reference(x, KSIZE)
    assert out.shape == ref.shape == (N, C, -(-L // KSIZE))
    assert jnp.allclose(out, ref)

    print("KERNEL_OK")
</pallas_src>

<mosaic_0001>
module attributes {stable_mosaic.version = 11 : i64} {
  func.func @_pool_kernel(%arg0: i32, %arg1: i32, %arg2: memref<3x8x128xf32, #tpu.memory_space<vmem>>, %arg3: memref<8x128xf32, #tpu.memory_space<vmem>>) attributes {dimension_semantics = [#tpu.dimension_semantics<parallel>, #tpu.dimension_semantics<parallel>], iteration_bounds = array<i64: 1, 1>, scalar_prefetch = 0 : i64, scratch_operands = 0 : i64, tpu.core_type = #tpu.core_type<tc>, window_params = [{transform_indices = @transform_0, window_bounds = array<i64: 3, 8, 128>}, {transform_indices = @transform_1, window_bounds = array<i64: 8, 128>}]} {
    %c0 = arith.constant 0 : index
    %c0_0 = arith.constant 0 : index
    %c0_1 = arith.constant 0 : index
    %0 = vector.load %arg2[%c0, %c0_0, %c0_1] : memref<3x8x128xf32, #tpu.memory_space<vmem>>, vector<1x8x128xf32>
    %1 = vector.shape_cast %0 : vector<1x8x128xf32> to vector<8x128xf32>
    %c1 = arith.constant 1 : index
    %c0_2 = arith.constant 0 : index
    %c0_3 = arith.constant 0 : index
    %2 = vector.load %arg2[%c1, %c0_2, %c0_3] : memref<3x8x128xf32, #tpu.memory_space<vmem>>, vector<1x8x128xf32>
    %3 = vector.shape_cast %2 : vector<1x8x128xf32> to vector<8x128xf32>
    %4 = arith.maximumf %1, %3 : vector<8x128xf32>
    %c2 = arith.constant 2 : index
    %c0_4 = arith.constant 0 : index
    %c0_5 = arith.constant 0 : index
    %5 = vector.load %arg2[%c2, %c0_4, %c0_5] : memref<3x8x128xf32, #tpu.memory_space<vmem>>, vector<1x8x128xf32>
    %6 = vector.shape_cast %5 : vector<1x8x128xf32> to vector<8x128xf32>
    %7 = arith.maximumf %4, %6 : vector<8x128xf32>
    %c0_6 = arith.constant 0 : index
    %c0_7 = arith.constant 0 : index
    %8 = vector.load %arg3[%c0_6, %c0_7] : memref<8x128xf32, #tpu.memory_space<vmem>>, vector<8x128xf32>
    tpu.vector_store %arg3[%c0_6, %c0_7], %7 {strides = array<i32>} : memref<8x128xf32, #tpu.memory_space<vmem>>, vector<8x128xf32>,
    return
  }
  func.func @transform_0(%arg0: i32, %arg1: i32) -> (i32, i32, i32) {
    %c0_i32 = arith.constant 0 : i32
    %c0_i32_0 = arith.constant 0 : i32
    return %c0_i32, %arg0, %arg1 : i32, i32, i32
  }
  func.func @transform_1(%arg0: i32, %arg1: i32) -> (i32, i32) {
    %c0_i32 = arith.constant 0 : i32
    return %arg0, %arg1 : i32, i32
  }
}

</mosaic_0001>

<bundles_post_ra>
// kernel: custom_max_pool1d.1
= control target key start
LH: loop header
LB: loop body
LE: loop exit
PB: predicated region body
PF: predicated region fallthrough
CT: control target
= control target key end

     0   :  { %s90_s0 = inlined_call_operand.vmem [shape: f32[3,8,128], index: 0, kind: input, shape index: {}]   ;;  %s91_s1 = inlined_call_operand.hbm [shape: f32[8,128], index: 1, kind: output, shape index: {}]  }
   0x1   :  { %v9_v0 = vld [vmem:[%s90_s0] sm:$0xff]  ;;  %v31_v1 = vld [vmem:[%s90_s0 + $0x8] sm:$0xff]  ;;  %v32_v2 = vld [vmem:[%s90_s0 + $0x10] sm:$0xff] }
   0x2   :  { %v12_v3 = vmax.f32 %v9_v0, %v31_v1 }
   0x3   :  { %6 = vsyncpa [#allocation3], 0  ;;  %s58_s12 = smov [#allocation2]  }
   0x4   :  { %s23_s13 = sshll.u32 %s58_s12, 4  ;;  %v15_v4 = vmax.f32 %v12_v3, %v32_v2  ;;  %s24_s13 = int_to_ptr.vmem [resolvable:$true] %s23_s13 }
   0x5   :  { %s34_s14 = scalar_lea.vmem %s24_s13, 128  ;;  %p39_p1 = scmp.lt.s32.totalorder %s24_s13, %s24_s13 }
   0x6   :  { %16 = vst [vmem:[#allocation2] sm:$0xff] %v15_v4  ;;  %p35_p0 = scmp.ne.s32.totalorder %s24_s13, %s34_s14  ;;  %p40_p2 = scmp.lt.s32.totalorder %s34_s14, %s34_s14 }
   0x8   :  { %p41_p3 = por %p40_p2, %p39_p1 }
   0xa   :  { %p42_p4 = pnand %p41_p3, %p35_p0 }
   0xc   :  { %45 = shalt.err (!%p42_p4)
}
   0xd   :  { %s46_s17 = scalar_lea.hbm %s91_s1, 128 }
   0xe   :  { %p47_p5 = scmp.ne.s32.totalorder %s91_s1, %s46_s17  ;;  %p50_p6 = scmp.lt.u32.totalorder %s46_s17, %s91_s1 }
  0x10   :  { %p52_p7 = pnand %p50_p6, %p47_p5 }
  0x12   :  { %55 = shalt.err (!%p52_p7)
}
  0x13   :  { %26 = dma.vmem_to_hbm [thread:$0]  %s24_s13, 128, %s91_s1, [#allocation3]  }
  0x14   :  { %56 = dma.done.wait [#allocation3], 128  }
  0x15   :  { %57 = vsyncadd [#allocation3], 4294967168 }
  0x16   :  { %30 = vsyncpa [#allocation3], 1 }

</bundles_post_ra>
